<compile_context>
chip_gen: v5e
topology: v5e:2x2
jax: 0.10.0
libtpu: 0.0.40
codegen_flags: <defaults>
</compile_context>

<pallas_src>
import jax
import jax.numpy as jnp
from jax.experimental import pallas as pl
from jax.experimental.pallas import tpu as pltpu


def _randint_kernel(state_ref, val_ref, new_state_ref):
    # state_ref:     SMEM (1,) int32  -- current RNG state (input)
    # val_ref:       SMEM (1,) int32  -- drawn value in [0, 100] (output)
    # new_state_ref: SMEM (1,) int32  -- advanced RNG state (output)
    s = state_ref[0].astype(jnp.uint32)

    # Advance the persistent state with a 32-bit LCG (scalar-core only).
    s_next = s * jnp.uint32(1664525) + jnp.uint32(1013904223)
    new_state_ref[0] = s_next.astype(jnp.int32)

    # Mix the new state (xorshift-multiply rounds) to decorrelate draws.
    m = s_next
    m = m ^ (m >> jnp.uint32(16))
    m = m * jnp.uint32(2654435761)
    m = m ^ (m >> jnp.uint32(13))
    m = m * jnp.uint32(2246822519)
    m = m ^ (m >> jnp.uint32(16))

    # Map the top 16 bits onto [0, 100] inclusive via multiply-high (no modulo).
    hi16 = m >> jnp.uint32(16)
    val = (hi16 * jnp.uint32(101)) >> jnp.uint32(16)
    val_ref[0] = val.astype(jnp.int32)


@jax.jit
def _randint_step(state):
    """state: (1,) int32 device array -> (value int32 scalar, new state (1,) int32)."""
    val, new_state = pl.pallas_call(
        _randint_kernel,
        out_shape=(
            jax.ShapeDtypeStruct((1,), jnp.int32),
            jax.ShapeDtypeStruct((1,), jnp.int32),
        ),
        in_specs=[pl.BlockSpec(memory_space=pltpu.MemorySpace.SMEM)],
        out_specs=(
            pl.BlockSpec(memory_space=pltpu.MemorySpace.SMEM),
            pl.BlockSpec(memory_space=pltpu.MemorySpace.SMEM),
        ),
    )(state)
    return val[0], new_state


# Persistent on-device RNG state (analogue of Python's global `random` state).
_rng_state = None


def _seed_rng(seed: int):
    global _rng_state
    _rng_state = jnp.asarray([seed], dtype=jnp.int32)


def random_model_forward(path=None):
    """Mirrors RandomModel.forward: ignores `path`, returns an int32 scalar in
    [0, 100].  Advances the persistent on-device RNG state each call."""
    global _rng_state
    del path  # the reference module ignores its input entirely
    if _rng_state is None:
        _seed_rng(0)
    val, _rng_state = _randint_step(_rng_state)
    return val


if __name__ == "__main__":
    key = jax.random.PRNGKey(0)
    # Dummy "path" stand-in (the reference forward ignores it completely).
    path_placeholder = jax.random.normal(key, (2, 4), dtype=jnp.float32)

    # Deterministic seed for the persistent on-device RNG state.
    _seed_rng(20240607)

    r1 = random_model_forward(path_placeholder)
    r2 = random_model_forward(path_placeholder)  # state advanced -> fresh draw
    jax.block_until_ready((r1, r2))

    v1, v2 = int(r1), int(r2)
    assert 0 <= v1 <= 100, f"value {v1} out of range [0, 100]"
    assert 0 <= v2 <= 100, f"value {v2} out of range [0, 100]"
    print("KERNEL_OK")
</pallas_src>

<mosaic_0001>
module attributes {stable_mosaic.version = 11 : i64} {
  func.func @_randint_kernel(%arg0: memref<1xi32, #tpu.memory_space<smem>>, %arg1: memref<1xi32, #tpu.memory_space<smem>>, %arg2: memref<1xi32, #tpu.memory_space<smem>>) attributes {dimension_semantics = [], scalar_prefetch = 0 : i64, scratch_operands = 0 : i64, tpu.core_type = #tpu.core_type<tc>} {
    %c0 = arith.constant 0 : index
    %0 = memref.load %arg0[%c0] : memref<1xi32, #tpu.memory_space<smem>>
    %c1664525_i32 = arith.constant 1664525 : i32
    %1 = arith.muli %0, %c1664525_i32 : i32
    %c1013904223_i32 = arith.constant 1013904223 : i32
    %2 = arith.addi %1, %c1013904223_i32 : i32
    %c0_0 = arith.constant 0 : index
    %3 = memref.load %arg2[%c0_0] : memref<1xi32, #tpu.memory_space<smem>>
    memref.store %2, %arg2[%c0_0] : memref<1xi32, #tpu.memory_space<smem>>
    %c16_i32 = arith.constant 16 : i32
    %4 = arith.shrui %2, %c16_i32 : i32
    %5 = arith.xori %2, %4 : i32
    %c-1640531535_i32 = arith.constant -1640531535 : i32
    %6 = arith.muli %5, %c-1640531535_i32 : i32
    %c13_i32 = arith.constant 13 : i32
    %7 = arith.shrui %6, %c13_i32 : i32
    %8 = arith.xori %6, %7 : i32
    %c-2048144777_i32 = arith.constant -2048144777 : i32
    %9 = arith.muli %8, %c-2048144777_i32 : i32
    %c16_i32_1 = arith.constant 16 : i32
    %10 = arith.shrui %9, %c16_i32_1 : i32
    %11 = arith.xori %9, %10 : i32
    %c16_i32_2 = arith.constant 16 : i32
    %12 = arith.shrui %11, %c16_i32_2 : i32
    %c101_i32 = arith.constant 101 : i32
    %13 = arith.muli %12, %c101_i32 : i32
    %c16_i32_3 = arith.constant 16 : i32
    %14 = arith.shrui %13, %c16_i32_3 : i32
    %c0_4 = arith.constant 0 : index
    %15 = memref.load %arg1[%c0_4] : memref<1xi32, #tpu.memory_space<smem>>
    memref.store %14, %arg1[%c0_4] : memref<1xi32, #tpu.memory_space<smem>>
    return
  }
}

</mosaic_0001>

<bundles_post_ra>
// kernel: _randint_step.1
= control target key start
LH: loop header
LB: loop body
LE: loop exit
PB: predicated region body
PF: predicated region fallthrough
CT: control target
= control target key end

     0   :  { %9 = vsyncpa [#allocation4], 0  ;;  %s116_s0 = inlined_call_operand.<no memory space> [shape: s32[1], index: 0, kind: input, shape index: {}]   ;;  %s117_s1 = inlined_call_operand.hbm [shape: s32[1], index: 1, kind: output, shape index: {0}]   ;;  %s118_s2 = inlined_call_operand.hbm [shape: s32[1], index: 2, kind: output, shape index: {1}]  }
   0x1   :  { %s14_s11 = smul.u32 1664525, %s116_s0 }
   0x2   :  { %10 = vsyncpa [#allocation6], 0  ;;  %s45_s15 = sshll.u32 %s118_s2, 4  ;;  %s90_s19 = smov [#allocation5]   ;;  %s46_s15 = int_to_ptr.hbm [resolvable:$true] %s45_s15 }
   0x3   :  { %s15_s12 = sadd.s32 1013904223, %s14_s11  ;;  %s36_s26 = sshll.u32 %s117_s1, 4  ;;  %s37_s26 = int_to_ptr.hbm [resolvable:$true] %s36_s26 }
   0x4   :  { %s18_s16 = sshrl.u32 %s15_s12, 16  ;;  %17 = sst [smem:[#allocation5]] %s15_s12 }
   0x5   :  { %s19_s17 = sxor.u32 %s18_s16, %s15_s12  ;;  %s91_s29 = smov [#allocation3]  }
   0x6   :  { %s20_s18 = smul.u32 2654435761, %s19_s17 }
   0x7   :  { %48 = dma.smem_to_hbm %s90_s19, 16, %s46_s15, [#allocation6]  }
   0x8   :  { %s21_s20 = sshrl.u32 %s20_s18, 13 }
   0x9   :  { %s22_s21 = sxor.u32 %s21_s20, %s20_s18 }
   0xa   :  { %s23_s22 = smul.u32 2246822519, %s22_s21 }
   0xc   :  { %s24_s23 = sshrl.u32 %s23_s22, 16 }
   0xd   :  { %s25_s24 = sxor.u32 %s24_s23, %s23_s22 }
   0xe   :  { %s26_s27 = sshrl.u32 %s25_s24, 16 }
   0xf   :  { %s27_s28 = smul.u32 101, %s26_s27 }
  0x11   :  { %s28_s2 = sshrl.u32 %s27_s28, 16 }
  0x12   :  { %30 = sst [smem:[#allocation3]] %s28_s2 }
  0x13   :  { %39 = dma.smem_to_hbm %s91_s29, 16, %s37_s26, [#allocation4]  }
  0x14   :  { %86 = dma.done.wait [#allocation4], 16  }
  0x15   :  { %87 = vsyncadd [#allocation4], 4294967280 }
  0x16   :  { %88 = dma.done.wait [#allocation6], 16  }
  0x17   :  { %89 = vsyncadd [#allocation6], 4294967280 }
  0x18   :  { %57 = sfence }
  0x19   :  { %58 = vsyncpa [#allocation4], 1 }
  0x1a   :  { %59 = vsyncpa [#allocation6], 1 }

</bundles_post_ra>
